<compile_context>
chip_gen: v7x
topology: tpu7x:2x2x1
jax: 0.10.0
libtpu: 0.0.40
codegen_flags: <defaults>
</compile_context>

<pallas_src>
import functools

import jax
import jax.numpy as jnp
from jax import lax
from jax.experimental import pallas as pl
from jax.experimental.pallas import tpu as pltpu


def _round_up(n: int, m: int) -> int:
    return ((n + m - 1) // m) * m


# ----------------------------- Pallas kernel --------------------------------
def _block_diagonal_kernel(*refs, constrained, use_bias, compute_dtype):
    """One batch-tile of y = x @ constrain(W).T (+ bias).

    `constrained` / `use_bias` / `compute_dtype` are compile-time Python
    values, so all branches below are resolved at trace time.
    Ref layout: x, w, [mask], [bias], out.
    """
    it = iter(refs)
    x_ref = next(it)
    w_ref = next(it)
    mask_ref = next(it) if constrained != "orthogonal" else None
    bias_ref = next(it) if use_bias else None
    o_ref = next(it)

    x32 = x_ref[...]
    w = w_ref[...]

    if constrained != "orthogonal":
        # Default path (None / "fixed" / "tanh" / "clip"): keep block support.
        w = w * mask_ref[...]
        if constrained == "tanh":
            w = jnp.tanh(w)
        elif constrained == "clip":
            w = jnp.clip(w, -0.999, 0.999)
    else:
        # Skew-symmetric generator S = W - W.T; the Cayley-like expansion
        # W_eff = I + S + S@S/2 is applied implicitly via x@S matmuls below.
        w = w - w.T

    # Optional narrow-precision MXU inputs (constraint math stayed in f32).
    x = x32.astype(compute_dtype) if compute_dtype is not None else x32
    wmat = w.astype(compute_dtype) if compute_dtype is not None else w

    dims_t = (((1,), (1,)), ((), ()))  # contract x last axis with W last axis == x @ W.T
    dims_n = (((1,), (0,)), ((), ()))  # x @ W

    if constrained != "orthogonal":
        # F.linear: y = x @ W_eff.T, contraction over W's last axis (no transpose).
        y = lax.dot_general(x, wmat, dims_t, preferred_element_type=jnp.float32)
    else:
        # W_eff.T = I - S + S@S/2   =>   y = x - x@S + 0.5*((x@S)@S)
        xs = lax.dot_general(x, wmat, dims_n, preferred_element_type=jnp.float32)
        xs_c = xs.astype(compute_dtype) if compute_dtype is not None else xs
        y = x32 - xs + 0.5 * lax.dot_general(
            xs_c, wmat, dims_n, preferred_element_type=jnp.float32)

    if use_bias:
        y = y + bias_ref[...]          # (1, d) broadcasts over the batch tile
    o_ref[...] = y.astype(o_ref.dtype)


# ------------------------------- wrapper -------------------------------------
def block_diagonal_forward(x, weight, mask=None, bias=None, constrained=None,
                           compute_dtype=None):
    """y = x @ constrain(weight).T + bias  (Pallas TPU).

    x:      (batch, layer_size) float32
    weight: (layer_size, layer_size) block-diagonal values
    mask:   (layer_size, layer_size) 1.0 on block support (ignored for
            constrained == "orthogonal", matching the PyTorch module)
    bias:   optional (layer_size,)
    compute_dtype: optional MXU-operand dtype (e.g. jnp.bfloat16 on v6e/v7x).
    """
    batch, d_in = x.shape
    d_out, d_in_w = weight.shape
    assert d_in_w == d_in
    use_bias = bias is not None
    use_mask = constrained != "orthogonal"
    if use_mask and mask is None:
        mask = (weight != 0)

    # Lane/sublane-aligned padded shapes: features -> multiple of 128,
    # batch -> multiple of 8 (or 128 when it gets tiled).
    d_in_p = _round_up(d_in, 128)
    d_out_p = _round_up(d_out, 128)
    if constrained == "orthogonal":
        d_in_p = d_out_p = max(d_in_p, d_out_p)   # W - W.T needs a square tile
    b_p = _round_up(batch, 8)
    tb = 128 if b_p > 128 else b_p
    b_p = _round_up(b_p, tb)

    x_p = jnp.pad(x, ((0, b_p - batch), (0, d_in_p - d_in)))
    w_p = jnp.pad(weight, ((0, d_out_p - d_out), (0, d_in_p - d_in)))

    operands = [x_p, w_p]
    in_specs = [
        pl.BlockSpec((tb, d_in_p), lambda i: (i, 0)),
        pl.BlockSpec((d_out_p, d_in_p), lambda i: (0, 0)),
    ]
    if use_mask:
        m_p = jnp.pad(mask.astype(weight.dtype),
                      ((0, d_out_p - d_out), (0, d_in_p - d_in)))
        operands.append(m_p)
        in_specs.append(pl.BlockSpec((d_out_p, d_in_p), lambda i: (0, 0)))
    if use_bias:
        b2 = jnp.pad(bias.reshape(1, d_out).astype(x.dtype),
                     ((0, 0), (0, d_out_p - d_out)))
        operands.append(b2)
        in_specs.append(pl.BlockSpec((1, d_out_p), lambda i: (0, 0)))

    kernel = functools.partial(
        _block_diagonal_kernel, constrained=constrained,
        use_bias=use_bias, compute_dtype=compute_dtype)

    y_p = pl.pallas_call(
        kernel,
        out_shape=jax.ShapeDtypeStruct((b_p, d_out_p), x.dtype),
        grid=(b_p // tb,),
        in_specs=in_specs,
        out_specs=pl.BlockSpec((tb, d_out_p), lambda i: (i, 0)),
        compiler_params=pltpu.CompilerParams(
            dimension_semantics=("parallel",)),
    )(*operands)

    return y_p[:batch, :d_out]


# ------------------------------ parameter setup ------------------------------
def make_block_diagonal(blocks):
    """Assemble a dense block-diagonal matrix from a list of square blocks."""
    sizes = [b.shape[0] for b in blocks]
    n = sum(sizes)
    out = jnp.zeros((n, n), dtype=blocks[0].dtype)
    off = 0
    for b, s in zip(blocks, sizes):
        out = out.at[off:off + s, off:off + s].set(b)
        off += s
    return out


def reference_forward(x, weight, mask, bias, constrained):
    if constrained != "orthogonal":
        w = weight * mask
        if constrained == "tanh":
            w = jnp.tanh(w)
        elif constrained == "clip":
            w = jnp.clip(w, -0.999, 0.999)
    else:
        symm = weight - weight.T
        w = jnp.eye(weight.shape[0], dtype=weight.dtype) + symm + symm @ symm / 2
    y = x @ w.T
    if bias is not None:
        y = y + bias
    return y


if __name__ == "__main__":
    key = jax.random.PRNGKey(0)
    k_blocks, k_x, k_bias = jax.random.split(key, 3)

    # Block sizes -> layer_size = 32 (hidden=32).
    block_sizes = [8, 8, 16]
    bkeys = jax.random.split(k_blocks, len(block_sizes))
    blocks = [jax.random.normal(bk, (s, s), dtype=jnp.float32)
              for bk, s in zip(bkeys, block_sizes)]

    weight = make_block_diagonal(blocks)                       # (32, 32)
    mask = (weight != 0).astype(jnp.float32)                   # block support
    layer_size = weight.shape[0]

    # bias ~ N(0, 1/sqrt(layer_size)), deterministic from PRNGKey(0)
    bias = jax.random.normal(k_bias, (layer_size,), dtype=jnp.float32) \
        / jnp.sqrt(jnp.float32(layer_size))

    batch = 8
    x = jax.random.normal(k_x, (batch, layer_size), dtype=jnp.float32)

    # Default constraint path (mask-only), with bias.
    y = block_diagonal_forward(x, weight, mask, bias, constrained=None)
    jax.block_until_ready(y)
    y_ref = reference_forward(x, weight, mask, bias, None)
    assert y.shape == (batch, layer_size)
    assert jnp.allclose(y, y_ref, atol=1e-5, rtol=1e-5)

    # "orthogonal" constraint branch (mask / eye never touched in-kernel).
    y_orth = block_diagonal_forward(x, weight, mask, bias, constrained="orthogonal")
    jax.block_until_ready(y_orth)
    y_orth_ref = reference_forward(x, weight, mask, bias, "orthogonal")
    assert jnp.allclose(y_orth, y_orth_ref, atol=1e-4, rtol=1e-4)

    # "tanh" constraint, no bias (exercises the operand-dropping paths).
    y_tanh = block_diagonal_forward(x, weight, mask, None, constrained="tanh")
    jax.block_until_ready(y_tanh)
    y_tanh_ref = reference_forward(x, weight, mask, None, "tanh")
    assert jnp.allclose(y_tanh, y_tanh_ref, atol=1e-5, rtol=1e-5)

    print("KERNEL_OK")
</pallas_src>

<mosaic_0001>
module attributes {stable_mosaic.version = 11 : i64} {
  func.func @_block_diagonal_kernel(%arg0: i32, %arg1: memref<8x128xf32, #tpu.memory_space<vmem>>, %arg2: memref<128x128xf32, #tpu.memory_space<vmem>>, %arg3: memref<128x128xf32, #tpu.memory_space<vmem>>, %arg4: memref<1x128xf32, #tpu.memory_space<vmem>>, %arg5: memref<8x128xf32, #tpu.memory_space<vmem>>) attributes {dimension_semantics = [#tpu.dimension_semantics<parallel>], iteration_bounds = array<i64: 1>, scalar_prefetch = 0 : i64, scratch_operands = 0 : i64, tpu.core_type = #tpu.core_type<tc>, window_params = [{transform_indices = @transform_0, window_bounds = array<i64: 8, 128>}, {pipeline_mode = #tpu.pipeline_mode<synchronous>, transform_indices = @transform_1, window_bounds = array<i64: 128, 128>}, {pipeline_mode = #tpu.pipeline_mode<synchronous>, transform_indices = @transform_2, window_bounds = array<i64: 128, 128>}, {pipeline_mode = #tpu.pipeline_mode<synchronous>, transform_indices = @transform_3, window_bounds = array<i64: 1, 128>}, {transform_indices = @transform_4, window_bounds = array<i64: 8, 128>}]} {
    %c0 = arith.constant 0 : index
    %c0_0 = arith.constant 0 : index
    %0 = vector.load %arg1[%c0, %c0_0] : memref<8x128xf32, #tpu.memory_space<vmem>>, vector<8x128xf32>
    %c0_1 = arith.constant 0 : index
    %c0_2 = arith.constant 0 : index
    %1 = vector.load %arg2[%c0_1, %c0_2] : memref<128x128xf32, #tpu.memory_space<vmem>>, vector<128x128xf32>
    %c0_3 = arith.constant 0 : index
    %c0_4 = arith.constant 0 : index
    %2 = vector.load %arg3[%c0_3, %c0_4] : memref<128x128xf32, #tpu.memory_space<vmem>>, vector<128x128xf32>
    %3 = arith.mulf %1, %2 : vector<128x128xf32>
    %cst = arith.constant dense<0.000000e+00> : vector<8x128xf32>
    %4 = tpu.matmul %0, %3, %cst {dimension_numbers = #tpu.dot_dimension_numbers<[1], [1], [0], [0], [0, 0, 1, 0], [], []>} : vector<8x128xf32>, vector<128x128xf32>, vector<8x128xf32> -> vector<8x128xf32>
    %c0_5 = arith.constant 0 : index
    %c0_6 = arith.constant 0 : index
    %5 = vector.load %arg4[%c0_5, %c0_6] : memref<1x128xf32, #tpu.memory_space<vmem>>, vector<1x128xf32>
    %6 = vector.broadcast %5 : vector<1x128xf32> to vector<8x128xf32>
    %7 = arith.addf %4, %6 : vector<8x128xf32>
    %c0_7 = arith.constant 0 : index
    %c0_8 = arith.constant 0 : index
    %8 = vector.load %arg5[%c0_7, %c0_8] : memref<8x128xf32, #tpu.memory_space<vmem>>, vector<8x128xf32>
    tpu.vector_store %arg5[%c0_7, %c0_8], %7 {strides = array<i32>} : memref<8x128xf32, #tpu.memory_space<vmem>>, vector<8x128xf32>,
    return
  }
  func.func @transform_0(%arg0: i32) -> (i32, i32) {
    %c0_i32 = arith.constant 0 : i32
    %c0_i32_0 = arith.constant 0 : i32
    return %arg0, %c0_i32 : i32, i32
  }
  func.func @transform_1(%arg0: i32) -> (i32, i32) {
    %c0_i32 = arith.constant 0 : i32
    %c0_i32_0 = arith.constant 0 : i32
    %c0_i32_1 = arith.constant 0 : i32
    return %c0_i32, %c0_i32_0 : i32, i32
  }
  func.func @transform_2(%arg0: i32) -> (i32, i32) {
    %c0_i32 = arith.constant 0 : i32
    %c0_i32_0 = arith.constant 0 : i32
    %c0_i32_1 = arith.constant 0 : i32
    return %c0_i32, %c0_i32_0 : i32, i32
  }
  func.func @transform_3(%arg0: i32) -> (i32, i32) {
    %c0_i32 = arith.constant 0 : i32
    %c0_i32_0 = arith.constant 0 : i32
    %c0_i32_1 = arith.constant 0 : i32
    return %c0_i32, %c0_i32_0 : i32, i32
  }
  func.func @transform_4(%arg0: i32) -> (i32, i32) {
    %c0_i32 = arith.constant 0 : i32
    %c0_i32_0 = arith.constant 0 : i32
    return %arg0, %c0_i32 : i32, i32
  }
}

</mosaic_0001>

<bundles_post_ra>
// kernel: tpu_custom_call.1
= control target key start
LH: loop header
LB: loop body
LE: loop exit
PB: predicated region body
PF: predicated region fallthrough
CT: control target
= control target key end

     0   :  { %9 = vsyncpa [#allocation3], 0  ;;  %s479_s0 = inlined_call_operand.hbm [shape: f32[8,128], index: 0, kind: input, shape index: {}]   ;;  %s480_s1 = inlined_call_operand.hbm [shape: f32[128,128], index: 1, kind: input, shape index: {}]   ;;  %s481_s2 = inlined_call_operand.hbm [shape: f32[128,128], index: 2, kind: input, shape index: {}]   ;;  %s482_s3 = inlined_call_operand.vmem [shape: f32[1,128], index: 3, kind: input, shape index: {}]   ;;  %s483_s4 = inlined_call_operand.hbm [shape: f32[8,128], index: 4, kind: output, shape index: {}]  }
   0x1   :  { %10 = vsyncpa [#allocation6], 0 }
   0x2   :  { %11 = vsyncpa [#allocation4], 0  ;;  %s380_s15 = smov [#allocation5]   ;;  %s286_s19 = scalar_lea.hbm %s480_s1, 2048 }
   0x3   :  { %s27_s16 = sshll.u32 %s380_s15, 4  ;;  %p287_p0 = scmp.ne.s32.totalorder %s480_s1, %s286_s19  ;;  %s28_s16 = int_to_ptr.vmem [resolvable:$true] %s27_s16 }
   0x4   :  { %p290_p1 = scmp.lt.u32.totalorder %s286_s19, %s480_s1 }
   0x6   :  { %p292_p2 = pnand %p290_p1, %p287_p0 }
   0x8   :  { %295 = shalt.err (!%p292_p2)
}
   0x9   :  { %s296_s24 = scalar_lea.vmem %s28_s16, 2048  ;;  %p301_p4 = scmp.lt.s32.totalorder %s28_s16, %s28_s16 }
   0xa   :  { %p297_p3 = scmp.ne.s32.totalorder %s28_s16, %s296_s24  ;;  %p302_p5 = scmp.lt.s32.totalorder %s296_s24, %s296_s24 }
   0xc   :  { %p303_p6 = por %p302_p5, %p301_p4 }
   0xe   :  { %p304_p7 = pnand %p303_p6, %p297_p3 }
  0x10   :  { %307 = shalt.err (!%p304_p7)
}
  0x11   :  { %s381_s25 = smov 128   ;;  %s382_s26 = smov 8  }
  0x12   :  { %33 = dma.hbm_to_vmem [thread:$0]  %s480_s1, 2048, %s28_s16, [#allocation6], %s381_s25, %s381_s25, %s382_s26  }
  0x13   :  { %s383_s29 = smov [#allocation2]   ;;  %s384_s5 = smov [#allocation7]  }
  0x14   :  { %s18_s30 = sshll.u32 %s383_s29, 4  ;;  %s39_s6 = sshll.u32 %s384_s5, 4  ;;  %s19_s30 = int_to_ptr.vmem [resolvable:$true] %s18_s30  ;;  %s40_s6 = int_to_ptr.vmem [resolvable:$true] %s39_s6 }
  0x15   :  { %s308_s9 = scalar_lea.hbm %s479_s0, 128 }
  0x16   :  { %p309_p8 = scmp.ne.s32.totalorder %s479_s0, %s308_s9  ;;  %p312_p9 = scmp.lt.u32.totalorder %s308_s9, %s479_s0 }
  0x18   :  { %p314_p10 = pnand %p312_p9, %p309_p8 }
  0x1a   :  { %317 = shalt.err (!%p314_p10)
}
  0x1b   :  { %s318_s1 = scalar_lea.vmem %s19_s30, 128  ;;  %p323_p12 = scmp.lt.s32.totalorder %s19_s30, %s19_s30 }
  0x1c   :  { %p319_p11 = scmp.ne.s32.totalorder %s19_s30, %s318_s1  ;;  %p324_p13 = scmp.lt.s32.totalorder %s318_s1, %s318_s1 }
  0x1e   :  { %p325_p0 = por %p324_p13, %p323_p12 }
  0x20   :  { %p326_p1 = pnand %p325_p0, %p319_p11 }
  0x22   :  { %329 = shalt.err (!%p326_p1)
}
  0x23   :  { %21 = dma.hbm_to_vmem [thread:$0]  %s479_s0, 128, %s19_s30, [#allocation3]  }
  0x24   :  { %s330_s18 = scalar_lea.hbm %s481_s2, 2048 }
  0x25   :  { %p331_p2 = scmp.ne.s32.totalorder %s481_s2, %s330_s18  ;;  %p334_p3 = scmp.lt.u32.totalorder %s330_s18, %s481_s2 }
  0x27   :  { %p336_p4 = pnand %p334_p3, %p331_p2 }
  0x29   :  { %339 = shalt.err (!%p336_p4)
}
  0x2a   :  { %s340_s23 = scalar_lea.vmem %s40_s6, 2048  ;;  %p345_p6 = scmp.lt.s32.totalorder %s40_s6, %s40_s6 }
  0x2b   :  { %p341_p5 = scmp.ne.s32.totalorder %s40_s6, %s340_s23  ;;  %p346_p7 = scmp.lt.s32.totalorder %s340_s23, %s340_s23 }
  0x2d   :  { %p347_p8 = por %p346_p7, %p345_p6 }
  0x2f   :  { %p348_p9 = pnand %p347_p8, %p341_p5 }
  0x31   :  { %351 = shalt.err (!%p348_p9)
}
  0x32   :  { %45 = dma.hbm_to_vmem [thread:$0]  %s481_s2, 2048, %s40_s6, [#allocation6], %s381_s25, %s381_s25, %s382_s26  }
  0x33   :  { %374 = dma.done.wait [#allocation3], 128  }
  0x34   :  { %375 = vsyncadd [#allocation3], 4294967168 }
  0x35   :  { %376 = dma.done.wait [#allocation6], 4096  }
  0x36   :  { %377 = vsyncadd [#allocation6], 4294963200  ;;  %v385_v0 = vmov 0.0|0.0   ;;  %vm386_vm0 = vmmov 0   ;;  %v387_v1 = vmov 0.0   ;;  %v58_v2 = vld [vmem:[#allocation5] sm:$0xff] }
  0x37   :  { %253 = vmatprep.subr.bf16.mxu0 %v385_v0  ;;  %250 = vmatprep.mubr.msk.f32.mxu0 %vm386_vm0, %v387_v1  ;;  %v59_v3 = vld [vmem:[#allocation5 + $0x8] sm:$0xff]  ;;  %v74_v4 = vld [vmem:[#allocation7] sm:$0xff]  ;;  %v60_v8 = vld [vmem:[#allocation5 + $0x10] sm:$0xff]  ;;  %s388_s26 = smov [#allocation8]  }
  0x38   :  { %v75_v5 = vld [vmem:[#allocation7 + $0x8] sm:$0xff]  ;;  %v90_v6 = vmul.f32 %v74_v4, %v58_v2  ;;  %v61_v9 = vld [vmem:[#allocation5 + $0x18] sm:$0xff]  ;;  %v76_v10 = vld [vmem:[#allocation7 + $0x10] sm:$0xff]  ;;  %s190_s27 = sshll.u32 %s388_s26, 4  ;;  %s191_s27 = int_to_ptr.vmem [resolvable:$true] %s190_s27 }
  0x39   :  { %v91_v7 = vmul.f32 %v75_v5, %v59_v3  ;;  %v77_v11 = vld [vmem:[#allocation7 + $0x18] sm:$0xff]  ;;  %v92_v13 = vmul.f32 %v76_v10, %v60_v8  ;;  %v62_v16 = vld [vmem:[#allocation5 + $0x20] sm:$0xff]  ;;  %v63_v17 = vld [vmem:[#allocation5 + $0x28] sm:$0xff]  ;;  %s352_s28 = scalar_lea.vmem %s191_s27, 128  ;;  %p357_p11 = scmp.lt.s32.totalorder %s191_s27, %s191_s27 }
  0x3a   :  { %v93_v14 = vmul.f32 %v77_v11, %v61_v9  ;;  %v78_v18 = vld [vmem:[#allocation7 + $0x20] sm:$0xff]  ;;  %v79_v19 = vld [vmem:[#allocation7 + $0x28] sm:$0xff]  ;;  %v64_v23 = vld [vmem:[#allocation5 + $0x30] sm:$0xff]  ;;  %p353_p10 = scmp.ne.s32.totalorder %s191_s27, %s352_s28  ;;  %p358_p12 = scmp.lt.s32.totalorder %s352_s28, %s352_s28 }
  0x3b   :  { %v254_v12 = vpack.c.bf16 %v91_v7, %v90_v6  ;;  %v94_v20 = vmul.f32 %v78_v18, %v62_v16  ;;  %v95_v21 = vmul.f32 %v79_v19, %v63_v17  ;;  %v65_v24 = vld [vmem:[#allocation5 + $0x38] sm:$0xff]  ;;  %v80_v25 = vld [vmem:[#allocation7 + $0x30] sm:$0xff]  ;;  %v66_v30 = vld [vmem:[#allocation5 + $0x40] sm:$0xff] }
  0x3c   :  { %v257_v15 = vpack.c.bf16 %v93_v14, %v92_v13  ;;  %v81_v26 = vld [vmem:[#allocation7 + $0x38] sm:$0xff]  ;;  %v96_v27 = vmul.f32 %v80_v25, %v64_v23  ;;  %v67_v31 = vld [vmem:[#allocation5 + $0x48] sm:$0xff]  ;;  %v82_v32 = vld [vmem:[#allocation7 + $0x40] sm:$0xff]  ;;  %p359_p13 = por %p358_p12, %p357_p11 }
  0x3d   :  { %255 = vmatpush3.bf16.xpose.msra.mxu0 %v254_v12  ;;  %v260_v22 = vpack.c.bf16 %v95_v21, %v94_v20  ;;  %v97_v28 = vmul.f32 %v81_v26, %v65_v24  ;;  %v83_v33 = vld [vmem:[#allocation7 + $0x48] sm:$0xff]  ;;  %v98_v34 = vmul.f32 %v82_v32, %v66_v30  ;;  %v68_v37 = vld [vmem:[#allocation5 + $0x50] sm:$0xff]  ;;  %v69_v38 = vld [vmem:[#allocation5 + $0x58] sm:$0xff] }
  0x3e   :  { %256 = vmatprep.subr.bf16.mxu0 %v385_v0  ;;  %v99_v35 = vmul.f32 %v83_v33, %v67_v31  ;;  %v84_v39 = vld [vmem:[#allocation7 + $0x50] sm:$0xff]  ;;  %v85_v40 = vld [vmem:[#allocation7 + $0x58] sm:$0xff]  ;;  %v70_v44 = vld [vmem:[#allocation5 + $0x60] sm:$0xff]  ;;  %p360_p0 = pnand %p359_p13, %p353_p10 }
  0x3f   :  { %v263_v29 = vpack.c.bf16 %v97_v28, %v96_v27  ;;  %v100_v41 = vmul.f32 %v84_v39, %v68_v37  ;;  %v101_v42 = vmul.f32 %v85_v40, %v69_v38  ;;  %v71_v45 = vld [vmem:[#allocation5 + $0x68] sm:$0xff]  ;;  %v86_v46 = vld [vmem:[#allocation7 + $0x60] sm:$0xff]  ;;  %v72_v51 = vld [vmem:[#allocation5 + $0x70] sm:$0xff] }
  0x40   :  { %v266_v36 = vpack.c.bf16 %v99_v35, %v98_v34  ;;  %v87_v47 = vld [vmem:[#allocation7 + $0x68] sm:$0xff]  ;;  %v102_v48 = vmul.f32 %v86_v46, %v70_v44  ;;  %v73_v52 = vld [vmem:[#allocation5 + $0x78] sm:$0xff]  ;;  %v88_v53 = vld [vmem:[#allocation7 + $0x70] sm:$0xff] }
  0x41   :  { %v269_v43 = vpack.c.bf16 %v101_v42, %v100_v41  ;;  %v103_v49 = vmul.f32 %v87_v47, %v71_v45  ;;  %v89_v54 = vld [vmem:[#allocation7 + $0x78] sm:$0xff]  ;;  %v104_v55 = vmul.f32 %v88_v53, %v72_v51 }
  0x42   :  { %v105_v56 = vmul.f32 %v89_v54, %v73_v52  ;;  %v57_v58 = vld [vmem:[#allocation2] sm:$0xff] }
  0x43   :  { %v272_v50 = vpack.c.bf16 %v103_v49, %v102_v48  ;;  %v200_v59 = vld [vmem:[%s482_s3] ss:$0 sm:$0xff] }
  0x44   :  { %v275_v57 = vpack.c.bf16 %v105_v56, %v104_v55 }
  0x45   :  { %258 = vmatpush3.bf16.xpose.msra.mxu0 %v257_v15 }
  0x46   :  { %259 = vmatprep.subr.bf16.mxu0 %v385_v0 }
  0x4d   :  { %261 = vmatpush3.bf16.xpose.msra.mxu0 %v260_v22 }
  0x4e   :  { %262 = vmatprep.subr.bf16.mxu0 %v385_v0 }
  0x55   :  { %264 = vmatpush3.bf16.xpose.msra.mxu0 %v263_v29 }
  0x56   :  { %265 = vmatprep.subr.bf16.mxu0 %v385_v0 }
  0x5d   :  { %267 = vmatpush3.bf16.xpose.msra.mxu0 %v266_v36 }
  0x5e   :  { %268 = vmatprep.subr.bf16.mxu0 %v385_v0 }
  0x65   :  { %270 = vmatpush3.bf16.xpose.msra.mxu0 %v269_v43 }
  0x66   :  { %271 = vmatprep.subr.bf16.mxu0 %v385_v0 }
  0x6d   :  { %273 = vmatpush3.bf16.xpose.msra.mxu0 %v272_v50 }
  0x6e   :  { %274 = vmatprep.subr.bf16.mxu0 %v385_v0 }
  0x75   :  { %276 = vmatpush3.bf16.xpose.msra.mxu0 %v275_v57 }
  0x7c   :  { %251 = vmatmul.mubr.f32.vlgmr.msra.gmra.mrb[0].mxu0 %v57_v58 }
 0x14f   :  { %v179_v60 = vpop.f32.mrb[0].mxu0 }
 0x150   :  { %v180_v61 = vadd.f32 %v200_v59, %v179_v60  ;;  %v252_v62 = vpop.f32.mrb[1].mxu0 }
 0x152   :  { %183 = vst [vmem:[#allocation8] sm:$0xff] %v180_v61 }
 0x153   :  { %363 = shalt.err (!%p360_p0)
}
 0x154   :  { %s364_s5 = scalar_lea.hbm %s483_s4, 128 }
 0x155   :  { %p365_p1 = scmp.ne.s32.totalorder %s483_s4, %s364_s5  ;;  %p368_p2 = scmp.lt.u32.totalorder %s364_s5, %s483_s4 }
 0x157   :  { %p370_p3 = pnand %p368_p2, %p365_p1 }
 0x159   :  { %373 = shalt.err (!%p370_p3)
}
 0x15a   :  { %193 = dma.vmem_to_hbm [thread:$0]  %s191_s27, 128, %s483_s4, [#allocation4]  }
 0x15b   :  { %378 = dma.done.wait [#allocation4], 128  }
 0x15c   :  { %379 = vsyncadd [#allocation4], 4294967168 }
 0x15d   :  { %197 = vsyncpa [#allocation3], 1 }
 0x15e   :  { %198 = vsyncpa [#allocation6], 1 }
 0x15f   :  { %199 = vsyncpa [#allocation4], 1 }

</bundles_post_ra>
